<compile_context>
chip_gen: v6e
topology: v6e:2x2x1
jax: 0.10.0
libtpu: 0.0.40
codegen_flags: <defaults>
</compile_context>

<pallas_src>
import functools

import jax
import jax.numpy as jnp
from jax import lax
from jax.experimental import pallas as pl
from jax.experimental.pallas import tpu as pltpu


def _round_up(x, m):
    return ((x + m - 1) // m) * m


def _contrastive_kernel(x1_ref, x2_ref, out_ref, m_ref, l_ref, diag_ref,
                        *, block, valid_in_last, mask_cols, x2_resident):
    qi = pl.program_id(0)
    ki = pl.program_id(1)
    nk = pl.num_programs(1)

    @pl.when(ki == 0)
    def _init():
        # -inf init is safe: every kv block contributes >= 1 valid column, so m
        # becomes finite on the first update (no exp(-inf - -inf) path exists).
        m_ref[...] = jnp.full(m_ref.shape, -jnp.inf, jnp.float32)
        l_ref[...] = jnp.zeros(l_ref.shape, jnp.float32)
        diag_ref[...] = jnp.zeros(diag_ref.shape, jnp.float32)

    # kv tile of the (pre-normalized) x2.
    if x2_resident:
        start = pl.multiple_of(ki * block, block)
        x2t = x2_ref[pl.ds(start, block), :]
    else:
        x2t = x2_ref[...]

    # (t, t) similarity tile.  NT contraction (both operands contract on their
    # lane dim) -> no transpose in front of the MXU.  1/temperature is already
    # folded into x1 by the wrapper.
    sim = lax.dot_general(
        x1_ref[...], x2t,
        dimension_numbers=(((1,), (1,)), ((), ())),
        preferred_element_type=jnp.float32,
    )

    # Diagonal logits (labels = arange) live only on the qi == ki tile.
    @pl.when(qi == ki)
    def _diag():
        r = lax.broadcasted_iota(jnp.int32, sim.shape, 0)
        c = lax.broadcasted_iota(jnp.int32, sim.shape, 1)
        diag_ref[...] = jnp.sum(jnp.where(r == c, sim, jnp.float32(0.0)),
                                axis=-1, keepdims=True)

    def _update(s):
        # Online logsumexp update over this kv tile.
        m_prev = m_ref[...]
        m_new = jnp.maximum(m_prev, jnp.max(s, axis=-1, keepdims=True))
        alpha = jnp.exp(m_prev - m_new)
        l_ref[...] = alpha * l_ref[...] + jnp.sum(jnp.exp(s - m_new),
                                                  axis=-1, keepdims=True)
        m_ref[...] = m_new

    if mask_cols:
        # Padded columns only exist in the last kv block; the masking work
        # (iota + compare + select) executes only there at runtime.
        @pl.when(ki < nk - 1)
        def _full():
            _update(sim)

        @pl.when(ki == nk - 1)
        def _last():
            c = lax.broadcasted_iota(jnp.int32, sim.shape, 1)
            # Finite sentinel: exp(-1e30 - m) underflows to exactly 0, no inf/NaN.
            _update(jnp.where(c < valid_in_last, sim, jnp.float32(-1e30)))
    else:
        _update(sim)

    @pl.when(ki == nk - 1)
    def _finalize():
        out_ref[...] = m_ref[...] + jnp.log(l_ref[...]) - diag_ref[...]


def contrastive_loss(x1, x2, temperature=0.1, block=512, use_bf16_matmul=False):
    """x1, x2: (B, D) arrays. Returns scalar f32 loss matching PyTorch ContrastiveLoss."""
    assert x1.shape == x2.shape and x1.ndim == 2
    B, D = x1.shape

    # MXU operand dtype: bf16 inputs stay bf16; f32 inputs stay f32 unless
    # use_bf16_matmul=True (bf16 operands, f32 accumulation, ~1e-3 sim error).
    if x1.dtype == jnp.bfloat16 or use_bf16_matmul:
        dot_dtype = jnp.bfloat16
    else:
        dot_dtype = jnp.float32

    # ---- Hoisted out of the kernel: L2-normalize once, fold 1/T into x1. ----
    eps = jnp.float32(1e-12)  # matches F.normalize's max(||x||, 1e-12) clamp
    x1f = x1.astype(jnp.float32)
    x2f = x2.astype(jnp.float32)
    x1n = (x1f / jnp.maximum(jnp.linalg.norm(x1f, axis=-1, keepdims=True), eps)
           * jnp.float32(1.0 / temperature)).astype(dot_dtype)
    x2n = (x2f / jnp.maximum(jnp.linalg.norm(x2f, axis=-1, keepdims=True), eps)
           ).astype(dot_dtype)

    # ---- Tile selection. ----
    t = min(block, _round_up(B, 8))
    # Guarantee >= 2 q blocks for non-trivial batches so the "parallel" q axis
    # can be sharded across both TensorCores on v7x (harmless on v5e/v6e).
    if B >= 16 and B <= t:
        t = _round_up((t + 1) // 2, 8)

    Dp = _round_up(D, 128)
    dsz = jnp.dtype(dot_dtype).itemsize

    # Generation-aware VMEM budget (v5e/v6e: 128 MiB, v7x: 64 MiB per TC).
    try:
        vmem_cap = int(pltpu.get_tpu_info().vmem_capacity_bytes)
    except Exception:
        vmem_cap = 64 * 1024 * 1024  # conservative: v7x per-TC VMEM
    budget = int(vmem_cap * 0.8)     # leave headroom for compiler scratch

    def _vmem_bytes(t_, resident_):
        bp_ = _round_up(B, t_)
        x1_b = 2 * t_ * Dp * dsz                              # double-buffered q tile
        x2_b = 2 * (bp_ if resident_ else t_) * Dp * dsz      # resident or streamed kv
        work = 3 * t_ * t_ * 4 + 8 * t_ * 4                   # sim / exp working set + scratch
        return x1_b + x2_b + work

    # Large-D safeguard (esp. v7x): shrink t until even the streamed tiles fit.
    while t > 8 and _vmem_bytes(t, False) > budget:
        t = max(8, _round_up(t // 2, 8))

    Bp = _round_up(B, t)
    n_blocks = Bp // t
    # Keep x2 fully VMEM-resident when it fits the budget: it is DMA'd from HBM
    # once (B*D bytes) instead of once per q block (B^2*D/t bytes).
    resident = _vmem_bytes(t, True) <= budget

    x1p = jnp.pad(x1n, ((0, Bp - B), (0, Dp - D)))
    x2p = jnp.pad(x2n, ((0, Bp - B), (0, Dp - D)))

    mask_cols = (Bp != B)
    valid_in_last = B - (n_blocks - 1) * t  # >= 1 by construction

    kernel = functools.partial(
        _contrastive_kernel,
        block=t,
        valid_in_last=valid_in_last,
        mask_cols=mask_cols,
        x2_resident=resident,
    )

    if resident:
        x2_spec = pl.BlockSpec((Bp, Dp), lambda qi, ki: (0, 0))     # DMA'd once, kv tile sliced in-kernel
    else:
        x2_spec = pl.BlockSpec((t, Dp), lambda qi, ki: (ki, 0))     # streamed over kv

    est = _vmem_bytes(t, resident)
    vmem_limit = budget if est > 12 * 1024 * 1024 else None

    per_row = pl.pallas_call(
        kernel,
        out_shape=jax.ShapeDtypeStruct((Bp, 1), jnp.float32),
        grid_spec=pltpu.PrefetchScalarGridSpec(
            num_scalar_prefetch=0,
            grid=(n_blocks, n_blocks),
            in_specs=[
                pl.BlockSpec((t, Dp), lambda qi, ki: (qi, 0)),       # x1: resident across kv
                x2_spec,
            ],
            out_specs=pl.BlockSpec((t, 1), lambda qi, ki: (qi, 0)),
            scratch_shapes=[
                pltpu.VMEM((t, 1), jnp.float32),   # running max
                pltpu.VMEM((t, 1), jnp.float32),   # running sum of exp
                pltpu.VMEM((t, 1), jnp.float32),   # diagonal logits
            ],
        ),
        compiler_params=pltpu.CompilerParams(
            dimension_semantics=("parallel", "arbitrary"),
            vmem_limit_bytes=vmem_limit,
        ),
    )(x1p, x2p)

    # Mean over the valid (un-padded) rows; padded rows are finite garbage.
    return jnp.mean(per_row[:B, 0])


def _reference(x1, x2, temperature=0.1):
    # Pure-JAX reference matching the PyTorch module.
    eps = 1e-12
    x1n = x1 / jnp.maximum(jnp.linalg.norm(x1, axis=-1, keepdims=True), eps)
    x2n = x2 / jnp.maximum(jnp.linalg.norm(x2, axis=-1, keepdims=True), eps)
    sim = x1n @ x2n.T / temperature
    lse = jax.nn.logsumexp(sim, axis=-1)
    diag = jnp.diagonal(sim)
    return jnp.mean(lse - diag)


if __name__ == "__main__":
    key = jax.random.PRNGKey(0)
    k1, k2, k3, k4 = jax.random.split(key, 4)

    # Small shapes consistent with the module's (batch, feature) inputs.
    B, D = 8, 32
    x1 = jax.random.normal(k1, (B, D), dtype=jnp.float32)
    x2 = jax.random.normal(k2, (B, D), dtype=jnp.float32)
    loss = jax.block_until_ready(contrastive_loss(x1, x2, temperature=0.1))
    ref = _reference(x1, x2, temperature=0.1)
    assert jnp.allclose(loss, ref, rtol=1e-4, atol=1e-4), (loss, ref)

    # Second config exercising the multi-block grid, the megacore q-split and
    # the last-kv-block padded-column masking path.
    B2, D2 = 20, 96
    y1 = jax.random.normal(k3, (B2, D2), dtype=jnp.float32)
    y2 = jax.random.normal(k4, (B2, D2), dtype=jnp.float32)
    loss2 = jax.block_until_ready(contrastive_loss(y1, y2, temperature=0.1))
    ref2 = _reference(y1, y2, temperature=0.1)
    assert jnp.allclose(loss2, ref2, rtol=1e-4, atol=1e-4), (loss2, ref2)

    print("KERNEL_OK")
</pallas_src>

<mosaic_0001>
module attributes {stable_mosaic.version = 11 : i64} {
  func.func @_contrastive_kernel(%arg0: i32, %arg1: i32, %arg2: memref<8x128xf32, #tpu.memory_space<vmem>>, %arg3: memref<8x128xf32, #tpu.memory_space<vmem>>, %arg4: memref<8x1xf32, #tpu.memory_space<vmem>>, %arg5: memref<8x1xf32, #tpu.memory_space<vmem>>, %arg6: memref<8x1xf32, #tpu.memory_space<vmem>>, %arg7: memref<8x1xf32, #tpu.memory_space<vmem>>) attributes {dimension_semantics = [#tpu.dimension_semantics<parallel>, #tpu.dimension_semantics<arbitrary>], iteration_bounds = array<i64: 1, 1>, scalar_prefetch = 0 : i64, scratch_operands = 3 : i64, tpu.core_type = #tpu.core_type<tc>, window_params = [{transform_indices = @transform_0, window_bounds = array<i64: 8, 128>}, {pipeline_mode = #tpu.pipeline_mode<synchronous>, transform_indices = @transform_1, window_bounds = array<i64: 8, 128>}, {transform_indices = @transform_2, window_bounds = array<i64: 8, 1>}]} {
    %c0_i32 = arith.constant 0 : i32
    %0 = arith.cmpi eq, %arg1, %c0_i32 : i32
    %1 = arith.extui %0 : i1 to i32
    %c0_i32_0 = arith.constant 0 : i32
    %2 = arith.cmpi ne, %1, %c0_i32_0 : i32
    scf.if %2 {
      %cst_16 = arith.constant 0xFF800000 : f32
      %31 = vector.broadcast %cst_16 : f32 to vector<8x1xf32>
      %c0_17 = arith.constant 0 : index
      %c0_18 = arith.constant 0 : index
      %32 = vector.load %arg5[%c0_17, %c0_18] : memref<8x1xf32, #tpu.memory_space<vmem>>, vector<8x1xf32>
      tpu.vector_store %arg5[%c0_17, %c0_18], %31 {strides = array<i32>} : memref<8x1xf32, #tpu.memory_space<vmem>>, vector<8x1xf32>,
      %cst_19 = arith.constant 0.000000e+00 : f32
      %33 = vector.broadcast %cst_19 : f32 to vector<8x1xf32>
      %c0_20 = arith.constant 0 : index
      %c0_21 = arith.constant 0 : index
      %34 = vector.load %arg6[%c0_20, %c0_21] : memref<8x1xf32, #tpu.memory_space<vmem>>, vector<8x1xf32>
      tpu.vector_store %arg6[%c0_20, %c0_21], %33 {strides = array<i32>} : memref<8x1xf32, #tpu.memory_space<vmem>>, vector<8x1xf32>,
      %cst_22 = arith.constant 0.000000e+00 : f32
      %35 = vector.broadcast %cst_22 : f32 to vector<8x1xf32>
      %c0_23 = arith.constant 0 : index
      %c0_24 = arith.constant 0 : index
      %36 = vector.load %arg7[%c0_23, %c0_24] : memref<8x1xf32, #tpu.memory_space<vmem>>, vector<8x1xf32>
      tpu.vector_store %arg7[%c0_23, %c0_24], %35 {strides = array<i32>} : memref<8x1xf32, #tpu.memory_space<vmem>>, vector<8x1xf32>,
    } else {
    }
    %c8_i32 = arith.constant 8 : i32
    %3 = arith.muli %arg1, %c8_i32 : i32
    %4 = tpu.assume_multiple %3, 8 : i32
    %5 = arith.index_cast %4 : i32 to index
    %c0 = arith.constant 0 : index
    %6 = vector.load %arg3[%5, %c0] : memref<8x128xf32, #tpu.memory_space<vmem>>, vector<8x128xf32>
    %c0_1 = arith.constant 0 : index
    %c0_2 = arith.constant 0 : index
    %7 = vector.load %arg2[%c0_1, %c0_2] : memref<8x128xf32, #tpu.memory_space<vmem>>, vector<8x128xf32>
    %cst = arith.constant dense<0.000000e+00> : vector<8x8xf32>
    %8 = tpu.matmul %7, %6, %cst {dimension_numbers = #tpu.dot_dimension_numbers<[1], [1], [0], [0], [0, 0, 1, 0], [], []>} : vector<8x128xf32>, vector<8x128xf32>, vector<8x8xf32> -> vector<8x8xf32>
    %9 = arith.cmpi eq, %arg0, %arg1 : i32
    %10 = arith.extui %9 : i1 to i32
    %c0_i32_3 = arith.constant 0 : i32
    %11 = arith.cmpi ne, %10, %c0_i32_3 : i32
    scf.if %11 {
      %31 = tpu.iota {dimensions = array<i32: 0>} : vector<8x8xi32>
      %32 = tpu.iota {dimensions = array<i32: 1>} : vector<8x8xi32>
      %33 = arith.cmpi eq, %31, %32 : vector<8x8xi32>
      %cst_16 = arith.constant 0.000000e+00 : f32
      %34 = vector.broadcast %cst_16 : f32 to vector<8x8xf32>
      %35 = arith.select %33, %8, %34 : vector<8x8xi1>, vector<8x8xf32>
      %cst_17 = arith.constant dense<0.000000e+00> : vector<8xf32>
      %36 = vector.multi_reduction <add>, %35, %cst_17 [1] : vector<8x8xf32> to vector<8xf32>
      %37 = vector.shape_cast %36 : vector<8xf32> to vector<8x1xf32>
      %c0_18 = arith.constant 0 : index
      %c0_19 = arith.constant 0 : index
      %38 = vector.load %arg7[%c0_18, %c0_19] : memref<8x1xf32, #tpu.memory_space<vmem>>, vector<8x1xf32>
      tpu.vector_store %arg7[%c0_18, %c0_19], %37 {strides = array<i32>} : memref<8x1xf32, #tpu.memory_space<vmem>>, vector<8x1xf32>,
    } else {
    }
    %c0_4 = arith.constant 0 : index
    %c0_5 = arith.constant 0 : index
    %12 = vector.load %arg5[%c0_4, %c0_5] : memref<8x1xf32, #tpu.memory_space<vmem>>, vector<8x1xf32>
    %cst_6 = arith.constant dense<0xFF800000> : vector<8xf32>
    %13 = vector.multi_reduction <maximumf>, %8, %cst_6 [1] : vector<8x8xf32> to vector<8xf32>
    %14 = vector.shape_cast %13 : vector<8xf32> to vector<8x1xf32>
    %15 = arith.maximumf %12, %14 : vector<8x1xf32>
    %16 = arith.subf %12, %15 : vector<8x1xf32>
    %17 = math.exp %16 : vector<8x1xf32>
    %c0_7 = arith.constant 0 : index
    %c0_8 = arith.constant 0 : index
    %18 = vector.load %arg6[%c0_7, %c0_8] : memref<8x1xf32, #tpu.memory_space<vmem>>, vector<8x1xf32>
    %19 = arith.mulf %17, %18 : vector<8x1xf32>
    %20 = vector.broadcast %15 : vector<8x1xf32> to vector<8x8xf32>
    %21 = arith.subf %8, %20 : vector<8x8xf32>
    %22 = math.exp %21 : vector<8x8xf32>
    %cst_9 = arith.constant dense<0.000000e+00> : vector<8xf32>
    %23 = vector.multi_reduction <add>, %22, %cst_9 [1] : vector<8x8xf32> to vector<8xf32>
    %24 = vector.shape_cast %23 : vector<8xf32> to vector<8x1xf32>
    %25 = arith.addf %19, %24 : vector<8x1xf32>
    %c0_10 = arith.constant 0 : index
    %c0_11 = arith.constant 0 : index
    %26 = vector.load %arg6[%c0_10, %c0_11] : memref<8x1xf32, #tpu.memory_space<vmem>>, vector<8x1xf32>
    tpu.vector_store %arg6[%c0_10, %c0_11], %25 {strides = array<i32>} : memref<8x1xf32, #tpu.memory_space<vmem>>, vector<8x1xf32>,
    %c0_12 = arith.constant 0 : index
    %c0_13 = arith.constant 0 : index
    %27 = vector.load %arg5[%c0_12, %c0_13] : memref<8x1xf32, #tpu.memory_space<vmem>>, vector<8x1xf32>
    tpu.vector_store %arg5[%c0_12, %c0_13], %15 {strides = array<i32>} : memref<8x1xf32, #tpu.memory_space<vmem>>, vector<8x1xf32>,
    %c0_i32_14 = arith.constant 0 : i32
    %28 = arith.cmpi eq, %arg1, %c0_i32_14 : i32
    %29 = arith.extui %28 : i1 to i32
    %c0_i32_15 = arith.constant 0 : i32
    %30 = arith.cmpi ne, %29, %c0_i32_15 : i32
    scf.if %30 {
      %c0_16 = arith.constant 0 : index
      %c0_17 = arith.constant 0 : index
      %31 = vector.load %arg5[%c0_16, %c0_17] : memref<8x1xf32, #tpu.memory_space<vmem>>, vector<8x1xf32>
      %c0_18 = arith.constant 0 : index
      %c0_19 = arith.constant 0 : index
      %32 = vector.load %arg6[%c0_18, %c0_19] : memref<8x1xf32, #tpu.memory_space<vmem>>, vector<8x1xf32>
      %33 = math.log %32 : vector<8x1xf32>
      %34 = arith.addf %31, %33 : vector<8x1xf32>
      %c0_20 = arith.constant 0 : index
      %c0_21 = arith.constant 0 : index
      %35 = vector.load %arg7[%c0_20, %c0_21] : memref<8x1xf32, #tpu.memory_space<vmem>>, vector<8x1xf32>
      %36 = arith.subf %34, %35 : vector<8x1xf32>
      %c0_22 = arith.constant 0 : index
      %c0_23 = arith.constant 0 : index
      %37 = vector.load %arg4[%c0_22, %c0_23] : memref<8x1xf32, #tpu.memory_space<vmem>>, vector<8x1xf32>
      tpu.vector_store %arg4[%c0_22, %c0_23], %36 {strides = array<i32>} : memref<8x1xf32, #tpu.memory_space<vmem>>, vector<8x1xf32>,
    } else {
    }
    return
  }
  func.func @transform_0(%arg0: i32, %arg1: i32) -> (i32, i32) {
    %c0_i32 = arith.constant 0 : i32
    %c0_i32_0 = arith.constant 0 : i32
    return %arg0, %c0_i32 : i32, i32
  }
  func.func @transform_1(%arg0: i32, %arg1: i32) -> (i32, i32) {
    %c0_i32 = arith.constant 0 : i32
    %c0_i32_0 = arith.constant 0 : i32
    %c0_i32_1 = arith.constant 0 : i32
    return %c0_i32, %c0_i32_0 : i32, i32
  }
  func.func @transform_2(%arg0: i32, %arg1: i32) -> (i32, i32) {
    %c0_i32 = arith.constant 0 : i32
    %c0_i32_0 = arith.constant 0 : i32
    return %arg0, %c0_i32 : i32, i32
  }
}

</mosaic_0001>

<bundles_post_ra>
// kernel: tpu_custom_call.1
= control target key start
LH: loop header
LB: loop body
LE: loop exit
PB: predicated region body
PF: predicated region fallthrough
CT: control target
= control target key end

     0   :  { %7 = vsyncpa [#allocation6], 0  ;;  %s280_s0 = inlined_call_operand.hbm [shape: f32[8,128], index: 0, kind: input, shape index: {}]   ;;  %s281_s1 = inlined_call_operand.hbm [shape: f32[8,128], index: 1, kind: input, shape index: {}]   ;;  %s282_s2 = inlined_call_operand.vmem [shape: f32[8,1], index: 2, kind: output, shape index: {}]  }
   0x1   :  { %8 = vsyncpa [#allocation8], 0  ;;  %s240_s9 = smov [#allocation5]   ;;  %s241_s11 = smov [#allocation7]  }
   0x2   :  { %s15_s10 = sshll.u32 %s240_s9, 4  ;;  %s25_s12 = sshll.u32 %s241_s11, 4  ;;  %s16_s10 = int_to_ptr.vmem [resolvable:$true] %s15_s10  ;;  %s26_s12 = int_to_ptr.vmem [resolvable:$true] %s25_s12 }
   0x3   :  { %s204_s13 = scalar_lea.vmem %s16_s10, 128  ;;  %p209_p1 = scmp.lt.s32.totalorder %s16_s10, %s16_s10 }
   0x4   :  { %p205_p0 = scmp.ne.s32.totalorder %s16_s10, %s204_s13  ;;  %p210_p2 = scmp.lt.s32.totalorder %s204_s13, %s204_s13 }
   0x6   :  { %p211_p3 = por %p210_p2, %p209_p1 }
   0x8   :  { %p212_p4 = pnand %p211_p3, %p205_p0 }
   0xa   :  { %215 = shalt.err (!%p212_p4)
}
   0xb   :  { %18 = dma.hbm_to_vmem [thread:$0]  %s280_s0, 128, %s16_s10, [#allocation6]  }
   0xc   :  { %s224_s16 = scalar_lea.vmem %s26_s12, 128  ;;  %p229_p6 = scmp.lt.s32.totalorder %s26_s12, %s26_s12 }
   0xd   :  { %p225_p5 = scmp.ne.s32.totalorder %s26_s12, %s224_s16  ;;  %p230_p7 = scmp.lt.s32.totalorder %s224_s16, %s224_s16 }
   0xf   :  { %p231_p8 = por %p230_p7, %p229_p6 }
  0x11   :  { %p232_p9 = pnand %p231_p8, %p225_p5 }
  0x13   :  { %235 = shalt.err (!%p232_p9)
}
  0x14   :  { %28 = dma.hbm_to_vmem [thread:$0]  %s281_s1, 128, %s26_s12, [#allocation8]  }
  0x15   :  { %236 = dma.done.wait [#allocation6], 128  }
  0x16   :  { %237 = vsyncadd [#allocation6], 4294967168 }
  0x17   :  { %238 = dma.done.wait [#allocation8], 128  }
  0x18   :  { %239 = vsyncadd [#allocation8], 4294967168  ;;  %vm39_vm0 = vcmask 7168   ;;  %v242_v0 = vmov 0.0   ;;  %vm243_vm1 = vmmov 0   ;;  %v45_v1 = vld [vmem:[#allocation7] sm:$0xff]  ;;  %v121_v15 = vlaneseq }
  0x19   :  { %41 = vst.msk [vmem:[#allocation3] sm:$0xff] %vm39_vm0, %v242_v0  ;;  %178 = vmatprep.subr.mxu0 %v242_v0  ;;  %42 = vst.msk [vmem:[#allocation4] sm:$0xff] %vm39_vm0, %v242_v0  ;;  %180 = vmatprep.mubr.msk.f32.mxu0 %vm243_vm1, %v242_v0  ;;  %v46_v2 = vld [vmem:[#allocation5] sm:$0xff]  ;;  %v244_v3 = vmov -inf   ;;  %vm127_vm2 = vcmask 64512   ;;  %v245_v7 = vmov 0  }
  0x1a   :  { %179 = vmatpush3.xpose.msra.mxu0 %v45_v1  ;;  %40 = vst.msk [vmem:[#allocation2] sm:$0xff] %vm39_vm0, %v244_v3  ;;  %189 = vset.pattern.permute.xlu0 %v245_v7  ;;  %v122_v16 = vshrl.u32 %v121_v15, 7  ;;  %v124_v17 = vand.u32 127, %v121_v15 }
  0x1c   :  { %vm125_vm3 = vcmp.eq.s32.totalorder %v122_v16, %v124_v17 }
  0x1d   :  { %181 = vmatmul.mubr.f32.vlgmr.msra.gmra.mxu0 %v46_v2 }
  0x20   :  { %v142_v24 = vld [vmem:[#allocation3] sm:$0xff] }
  0x21   :  { %v133_v8 = vld [vmem:[#allocation2] sm:$0xff] }
  0xdd   :  { %v113_v4 = vpop.f32.mrf.mxu0 }
  0xde   :  { %v135_v5 = vsel %vm127_vm2, %v113_v4, -inf  ;;  %v126_v20 = vsel %vm125_vm3, %v113_v4, 0.0 }
  0xdf   :  { %136 = vmax.xlane.f32.xlu0 %v135_v5  ;;  %v182_v6 = vpop.f32.mrf.mxu0  ;;  %v128_v21 = vsel %vm127_vm2, %v126_v20, 0.0 }
 0x168   :  { %v137_v9 = vpop.xlane.xlu0 %136 }
 0x169   :  { %v138_v10 = vmax.f32 %v133_v8, %v137_v9 }
 0x16b   :  { %v139_v11 = vsub.f32 %v133_v8, %v138_v10  ;;  %158 = vst.msk [vmem:[#allocation2] sm:$0xff] %vm39_vm0, %v138_v10  ;;  %146 = vperm.xlu0 %189, %v138_v10  }
 0x16d   :  { %v140_v22 = vmul.f32 1.442695, %v139_v11 }
 0x172   :  { %v162_v32 = vld [vmem:[#allocation2] sm:$0xff] }
 0x1e6   :  { %v147_v12 = vpop.permute.xlu0 %146 }
 0x1e7   :  { %v149_v13 = vsub.f32 %v113_v4, %v147_v12 }
 0x1e9   :  { %v150_v14 = vmul.f32 1.442695, %v149_v13 }
 0x1eb   :  { %190 = vpow2.f32 %v150_v14 }
 0x1ec   :  { %192 = vpow2.f32 %v140_v22 }
 0x1f8   :  { %v191_v18 = vpop.eup %190 }
 0x1f9   :  { %v152_v19 = vsel %vm127_vm2, %v191_v18, 0.0  ;;  %v193_v23 = vpop.eup %192 }
 0x1fa   :  { %153 = vadd.xlane.f32.xlu1 %v152_v19  ;;  %v143_v25 = vmul.f32 %v193_v23, %v142_v24 }
 0x1fe   :  { %129 = vadd.xlane.f32.xlu1 %v128_v21 }
 0x283   :  { %v154_v26 = vpop.xlane.xlu1 %153 }
 0x284   :  { %v155_v27 = vadd.f32 %v154_v26, %v143_v25 }
 0x286   :  { %157 = vst.msk [vmem:[#allocation3] sm:$0xff] %vm39_vm0, %v155_v27 }
 0x287   :  { %v130_v28 = vpop.xlane.xlu1 %129 }
 0x288   :  { %132 = vst.msk [vmem:[#allocation4] sm:$0xff] %vm39_vm0, %v130_v28 }
 0x28d   :  { %v163_v29 = vld [vmem:[#allocation3] sm:$0xff] }
 0x28e   :  { %194 = vlog2.f32 %v163_v29 }
 0x28f   :  { %v167_v34 = vld [vmem:[#allocation4] sm:$0xff] }
 0x29b   :  { %v195_v30 = vpop.eup %194 }
 0x29c   :  { %v165_v31 = vmul.f32 0.6931472, %v195_v30 }
 0x29e   :  { %v166_v33 = vadd.f32 %v165_v31, %v162_v32 }
 0x2a0   :  { %v168_v35 = vsub.f32 %v166_v33, %v167_v34 }
 0x2a2   :  { %169 = vst.msk [vmem:[%s282_s2] sm:$0xff] %vm39_vm0, %v168_v35 }
 0x2a3   :  { %174 = vsyncpa [#allocation6], 1 }
 0x2a4   :  { %175 = vsyncpa [#allocation8], 1 }

</bundles_post_ra>
